<compile_context>
chip_gen: v7x
topology: tpu7x:2x2x1
jax: 0.10.0
libtpu: 0.0.40
codegen_flags: <defaults>
</compile_context>

<pallas_src>
import functools

import jax
import jax.numpy as jnp
from jax import lax
from jax.experimental import pallas as pl
from jax.experimental.pallas import tpu as pltpu


def _sigmoid_via_tanh(x):
    # sigmoid(x) == 0.5 * (tanh(x / 2) + 1): a single EUP transcendental.
    return 0.5 * (jnp.tanh(0.5 * x) + 1.0)


def _fused_sublstm_kernel(premul_ref, h0_ref, c0_ref, w_ref, b_ref,   # inputs
                          hyseq_ref, hN_ref, cN_ref,                  # outputs
                          h_sc, c_sc,                                 # scratch
                          *, tc, t_total, needs_mask):
    chunk = pl.program_id(0)
    n_chunks = pl.num_programs(0)
    B, H = h0_ref.shape
    fourH = b_ref.shape[1]

    # Load the initial state into the carried VMEM scratch once.
    @pl.when(chunk == 0)
    def _():
        h_sc[...] = h0_ref[...].astype(jnp.float32)
        c_sc[...] = c0_ref[...].astype(jnp.float32)

    # Hoisted loop invariant: build the (B, 4H) f32 bias broadcast ONCE per
    # grid step (JAX does not CSE broadcast_in_dim inside the unrolled loop).
    bias = jnp.broadcast_to(b_ref[...].astype(jnp.float32), (B, fourH))

    def do_step(s):
        h = h_sc[...]
        c = c_sc[...]
        # Recurrent matmul on the MXU, f32 accumulation.  The weight stays a
        # VMEM ref read (feeds the MXU; hoisting its value would pin ~32 vregs
        # across the unrolled loop).
        rec = jnp.dot(h.astype(w_ref.dtype), w_ref[...],
                      preferred_element_type=jnp.float32)
        pre = premul_ref[s].astype(jnp.float32) + rec + bias
        gates = _sigmoid_via_tanh(pre)

        # chunk(4, dim=1).  H is a multiple of 128, so these lane-dim slices
        # are vreg-aligned (no cross-lane shuffles).
        ingate = gates[:, 0 * H:1 * H]
        forgetgate = gates[:, 1 * H:2 * H]
        cellgate = gates[:, 2 * H:3 * H]
        outgate = gates[:, 3 * H:4 * H]

        cy = forgetgate * c + (cellgate - ingate)
        hy = jnp.tanh(cy) - outgate

        # Carry state (f32) to the next step / chunk, stream hy out.
        h_sc[...] = hy
        c_sc[...] = cy
        hyseq_ref[s] = hy.astype(hyseq_ref.dtype)

    def body(s, carry):
        if needs_mask:
            # Skip padded timesteps on the (possibly ragged) last chunk.
            @pl.when(chunk * tc + s < t_total)
            def _():
                do_step(s)
        else:
            do_step(s)
        return carry

    lax.fori_loop(0, tc, body, 0, unroll=True)

    # Final-state blocks are resident (constant out index map) and are written
    # back to HBM only at grid end, so store them only on the last chunk.
    @pl.when(chunk == n_chunks - 1)
    def _():
        hN_ref[...] = h_sc[...].astype(hN_ref.dtype)
        cN_ref[...] = c_sc[...].astype(cN_ref.dtype)


def prepare_params(weight_hh, bias_hh, param_dtype=jnp.bfloat16):
    """One-time parameter prep (at init, NOT per step): W_hh (4H,H) -> (H,4H)."""
    w_t = jnp.asarray(weight_hh).T.astype(param_dtype)            # (H, 4H)
    b2d = jnp.asarray(bias_hh, dtype=jnp.float32).reshape(1, -1)  # (1, 4H)
    return w_t, b2d


def premul_sublstm_sequence(premul_seq, state, w_t, b2d, *,
                            time_chunk=8, out_dtype=None):
    """Run T fused PremulSubLSTMCell steps in ONE pallas_call.

    premul_seq: (T, B, 4H)   already input-premultiplied, any float dtype
    state:      (hx, cx), each (B, H)
    w_t:        (H, 4H) pre-transposed W_hh (bf16 or f32)
    b2d:        (1, 4H) bias
    Returns (hy_seq[(T, B, H)], (h_n, c_n)).
    """
    hx, cx = state
    T, B, fourH = premul_seq.shape
    H = hx.shape[1]
    assert fourH == 4 * H
    assert w_t.shape == (H, 4 * H)
    assert b2d.shape == (1, 4 * H)
    out_dtype = hx.dtype if out_dtype is None else jnp.dtype(out_dtype)

    # Timesteps fused per grid iteration; pad + in-kernel mask if T % tc != 0.
    tc = max(1, min(int(time_chunk), T))
    n_chunks = int(pl.cdiv(T, tc))
    t_pad = n_chunks * tc
    needs_mask = (t_pad != T)
    if needs_mask:
        premul_seq = jnp.pad(premul_seq, ((0, t_pad - T), (0, 0), (0, 0)))

    def isz(dt):
        return jnp.dtype(dt).itemsize

    # VMEM budget (resident single-buffered weight + double-buffered streams)
    # — sized against v7x's 64 MiB physical VMEM, not v5e/v6e's 128 MiB.
    vmem_needed = (
        w_t.size * isz(w_t.dtype)                      # resident weight (1x)
        + b2d.size * isz(b2d.dtype)                    # resident bias (1x)
        + 2 * tc * B * fourH * isz(premul_seq.dtype)   # premul stream (2x)
        + 2 * tc * B * H * isz(out_dtype)              # hy_seq stream (2x)
        + 4 * B * H * isz(hx.dtype)                    # h0/hN blocks
        + 4 * B * H * isz(cx.dtype)                    # c0/cN blocks
        + 2 * B * H * 4                                # f32 state scratch
    )
    vmem_limit = int(min(max(2 * vmem_needed + (8 << 20), 32 << 20), 60 << 20))

    cost = pl.CostEstimate(
        flops=T * (2 * B * H * fourH + 10 * B * fourH),
        transcendentals=T * B * 5 * H,                 # 4H sigmoids + H tanh
        bytes_accessed=(w_t.size * isz(w_t.dtype)
                        + b2d.size * isz(b2d.dtype)
                        + premul_seq.size * isz(premul_seq.dtype)
                        + t_pad * B * H * isz(out_dtype)
                        + 4 * B * H * isz(hx.dtype)),
    )

    kernel = functools.partial(_fused_sublstm_kernel,
                               tc=tc, t_total=T, needs_mask=needs_mask)

    hy_seq, h_n, c_n = pl.pallas_call(
        kernel,
        out_shape=(
            jax.ShapeDtypeStruct((t_pad, B, H), out_dtype),  # hy stream
            jax.ShapeDtypeStruct((B, H), hx.dtype),          # final h
            jax.ShapeDtypeStruct((B, H), cx.dtype),          # final c
        ),
        grid=(n_chunks,),
        in_specs=[
            pl.BlockSpec((tc, B, fourH), lambda t: (t, 0, 0)),   # premul stream
            pl.BlockSpec((B, H), lambda t: (0, 0)),              # h0 (once)
            pl.BlockSpec((B, H), lambda t: (0, 0)),              # c0 (once)
            # Resident, single-buffered whole-operand VMEM placement.
            pl.BlockSpec(memory_space=pltpu.MemorySpace.VMEM),   # W_hh.T
            pl.BlockSpec(memory_space=pltpu.MemorySpace.VMEM),   # bias
        ],
        out_specs=(
            pl.BlockSpec((tc, B, H), lambda t: (t, 0, 0)),       # hy_seq
            pl.BlockSpec((B, H), lambda t: (0, 0)),              # h_n (resident)
            pl.BlockSpec((B, H), lambda t: (0, 0)),              # c_n (resident)
        ),
        scratch_shapes=[
            pltpu.VMEM((B, H), jnp.float32),   # carried h state
            pltpu.VMEM((B, H), jnp.float32),   # carried c state
        ],
        # In-place state update: hx -> h_n, cx -> c_n.  Correct because the
        # constant-index h0/c0 blocks are fetched at grid start, while the
        # resident aliased outputs are only written back at grid end.
        input_output_aliases={1: 1, 2: 2},
        compiler_params=pltpu.CompilerParams(
            # The time axis is a true recurrence -> must stay sequential.
            dimension_semantics=("arbitrary",),
            vmem_limit_bytes=vmem_limit),
        cost_estimate=cost,
    )(premul_seq, hx, cx, w_t, b2d)

    if needs_mask:
        hy_seq = hy_seq[:T]
    return hy_seq, (h_n, c_n)


def premul_sublstm_cell(premul_input, state, w_t, b2d):
    """Single-step forward, identical to PremulSubLSTMCell.forward."""
    _, (h_n, c_n) = premul_sublstm_sequence(premul_input[None], state, w_t, b2d)
    return h_n, (h_n, c_n)


# ------------------------------ references ---------------------------------
def _reference_step_f32(premul_input, state, weight_hh, bias_hh):
    """Exact f32 PyTorch-module semantics (jax.nn.sigmoid)."""
    hx, cx = state
    gates = jax.nn.sigmoid(premul_input + hx @ weight_hh.T + bias_hh)
    H = hx.shape[1]
    i, f, z, o = (gates[:, 0:H], gates[:, H:2 * H],
                  gates[:, 2 * H:3 * H], gates[:, 3 * H:4 * H])
    cy = f * cx + (z - i)
    hy = jnp.tanh(cy) - o
    return hy, (hy, cy)


def _reference_sequence(premul_seq, state, w_t, b2d):
    """Scan reference matching the kernel's precision/formulation (same weight
    dtype, f32 accumulation, tanh-form sigmoid) — used to check the T-step
    recurrence plumbing."""
    H = state[0].shape[1]

    def step(carry, premul):
        hx, cx = carry
        pre = (premul.astype(jnp.float32)
               + jnp.dot(hx.astype(w_t.dtype), w_t,
                         preferred_element_type=jnp.float32)
               + b2d.astype(jnp.float32))
        gates = _sigmoid_via_tanh(pre)
        i, f, z, o = (gates[:, 0:H], gates[:, H:2 * H],
                      gates[:, 2 * H:3 * H], gates[:, 3 * H:4 * H])
        cy = f * cx + (z - i)
        hy = jnp.tanh(cy) - o
        return (hy, cy), hy

    (h_n, c_n), hy_seq = jax.lax.scan(step, state, premul_seq)
    return hy_seq, (h_n, c_n)


if __name__ == "__main__":
    B, H, T = 8, 128, 16
    input_size = 64  # unused in forward (input is already pre-multiplied)

    key = jax.random.PRNGKey(0)
    k_pm, k_hx, k_cx, k_w, k_b = jax.random.split(key, 5)

    premul_seq = jax.random.normal(k_pm, (T, B, 4 * H), jnp.float32)
    hx = jax.random.normal(k_hx, (B, H), jnp.float32)
    cx = jax.random.normal(k_cx, (B, H), jnp.float32)
    weight_hh = jax.random.normal(k_w, (4 * H, H), jnp.float32)
    bias_hh = jax.random.normal(k_b, (4 * H,), jnp.float32)

    # ---- exact f32 config: single-step check vs module semantics ----------
    w32, b32 = prepare_params(weight_hh, bias_hh, param_dtype=jnp.float32)
    cell_fn = jax.jit(premul_sublstm_cell)
    hy, (hy2, cy) = cell_fn(premul_seq[0], (hx, cx), w32, b32)
    jax.block_until_ready((hy, hy2, cy))

    hy_ref, (_, cy_ref) = _reference_step_f32(premul_seq[0], (hx, cx),
                                              weight_hh, bias_hh)
    assert jnp.allclose(hy, hy_ref, atol=2e-5, rtol=2e-5)
    assert jnp.allclose(cy, cy_ref, atol=2e-5, rtol=2e-5)
    assert jnp.array_equal(hy, hy2)

    # ---- f32-weight multi-step check (time-fused grid, 2 chunks of 8) ------
    # Loose tolerance: per-step numerics are anchored by the single-step check
    # above; tiny backend matmul-precision differences between the kernel and
    # the XLA reference can amplify through the 16-step recurrence.  This check
    # guards the chunked-recurrence plumbing (state carry, chunk indexing).
    seq32_fn = jax.jit(functools.partial(premul_sublstm_sequence, time_chunk=8))
    hy_seq32, (h32, c32) = seq32_fn(premul_seq, (hx, cx), w32, b32)
    jax.block_until_ready((hy_seq32, h32, c32))
    hy_ref32, (h_ref32, c_ref32) = _reference_sequence(premul_seq, (hx, cx),
                                                       w32, b32)
    assert hy_seq32.shape == (T, B, H)
    assert jnp.allclose(hy_seq32, hy_ref32, atol=5e-2, rtol=5e-2)
    assert jnp.allclose(h32, h_ref32, atol=5e-2, rtol=5e-2)
    assert jnp.allclose(c32, c_ref32, atol=5e-2, rtol=5e-2)
    assert jnp.allclose(h32, hy_seq32[-1], atol=1e-6, rtol=0.0)

    # ---- masked remainder path: T=13 with time_chunk=8 (padded last chunk) --
    T2 = 13
    hy_seq_o, (h_o, c_o) = seq32_fn(premul_seq[:T2], (hx, cx), w32, b32)
    jax.block_until_ready((hy_seq_o, h_o, c_o))
    hy_ref_o, (h_ref_o, c_ref_o) = _reference_sequence(premul_seq[:T2],
                                                       (hx, cx), w32, b32)
    assert hy_seq_o.shape == (T2, B, H)
    assert jnp.allclose(hy_seq_o, hy_ref_o, atol=5e-2, rtol=5e-2)
    assert jnp.allclose(h_o, h_ref_o, atol=5e-2, rtol=5e-2)
    assert jnp.allclose(c_o, c_ref_o, atol=5e-2, rtol=5e-2)

    # ---- perf config: bf16 resident weight, bf16 premul, bf16 hy_seq out ----
    wbf, bbf = prepare_params(weight_hh, bias_hh)              # bf16 weight
    premul_bf = premul_seq.astype(jnp.bfloat16)                # bf16 stream

    seq_fn = jax.jit(functools.partial(premul_sublstm_sequence,
                                       time_chunk=8, out_dtype=jnp.bfloat16))
    hy_seq, (h_n, c_n) = seq_fn(premul_bf, (hx, cx), wbf, bbf)
    jax.block_until_ready((hy_seq, h_n, c_n))

    hy_seq_ref, (h_n_ref, c_n_ref) = _reference_sequence(premul_bf, (hx, cx),
                                                         wbf, bbf)
    assert hy_seq.dtype == jnp.bfloat16
    assert jnp.allclose(hy_seq.astype(jnp.float32), hy_seq_ref,
                        atol=2e-2, rtol=2e-2)
    assert jnp.allclose(h_n, h_n_ref, atol=5e-3, rtol=5e-3)
    assert jnp.allclose(c_n, c_n_ref, atol=5e-3, rtol=5e-3)
    # hy and the new hidden state are the same tensor (up to bf16 rounding of
    # the streamed output).
    assert jnp.allclose(h_n, hy_seq[-1].astype(jnp.float32), atol=1e-2, rtol=0.0)

    print("KERNEL_OK")
</pallas_src>

<mosaic_0001>
module attributes {stable_mosaic.version = 11 : i64} {
  func.func @_fused_sublstm_kernel(%arg0: i32, %arg1: memref<1x8x512xf32, #tpu.memory_space<vmem>>, %arg2: memref<8x128xf32, #tpu.memory_space<vmem>>, %arg3: memref<8x128xf32, #tpu.memory_space<vmem>>, %arg4: memref<128x512xf32, #tpu.memory_space<vmem>>, %arg5: memref<1x512xf32, #tpu.memory_space<vmem>>, %arg6: memref<1x8x128xf32, #tpu.memory_space<vmem>>, %arg7: memref<8x128xf32, #tpu.memory_space<vmem>>, %arg8: memref<8x128xf32, #tpu.memory_space<vmem>>, %arg9: memref<8x128xf32, #tpu.memory_space<vmem>>, %arg10: memref<8x128xf32, #tpu.memory_space<vmem>>) attributes {dimension_semantics = [#tpu.dimension_semantics<arbitrary>], iteration_bounds = array<i64: 1>, scalar_prefetch = 0 : i64, scratch_operands = 2 : i64, tpu.core_type = #tpu.core_type<tc>, window_params = [{transform_indices = @transform_0, window_bounds = array<i64: 1, 8, 512>}, {pipeline_mode = #tpu.pipeline_mode<synchronous>, transform_indices = @transform_1, window_bounds = array<i64: 8, 128>}, {pipeline_mode = #tpu.pipeline_mode<synchronous>, transform_indices = @transform_2, window_bounds = array<i64: 8, 128>}, {pipeline_mode = #tpu.pipeline_mode<synchronous>, transform_indices = @transform_3, window_bounds = array<i64: 128, 512>}, {pipeline_mode = #tpu.pipeline_mode<synchronous>, transform_indices = @transform_4, window_bounds = array<i64: 1, 512>}, {transform_indices = @transform_5, window_bounds = array<i64: 1, 8, 128>}, {pipeline_mode = #tpu.pipeline_mode<synchronous>, transform_indices = @transform_6, window_bounds = array<i64: 8, 128>}, {pipeline_mode = #tpu.pipeline_mode<synchronous>, transform_indices = @transform_7, window_bounds = array<i64: 8, 128>}]} {
    %c0_i32 = arith.constant 0 : i32
    %0 = arith.cmpi eq, %arg0, %c0_i32 : i32
    %1 = arith.extui %0 : i1 to i32
    %c0_i32_0 = arith.constant 0 : i32
    %2 = arith.cmpi ne, %1, %c0_i32_0 : i32
    scf.if %2 {
      %c0_22 = arith.constant 0 : index
      %c0_23 = arith.constant 0 : index
      %40 = vector.load %arg2[%c0_22, %c0_23] : memref<8x128xf32, #tpu.memory_space<vmem>>, vector<8x128xf32>
      %c0_24 = arith.constant 0 : index
      %c0_25 = arith.constant 0 : index
      %41 = vector.load %arg9[%c0_24, %c0_25] : memref<8x128xf32, #tpu.memory_space<vmem>>, vector<8x128xf32>
      tpu.vector_store %arg9[%c0_24, %c0_25], %40 {strides = array<i32>} : memref<8x128xf32, #tpu.memory_space<vmem>>, vector<8x128xf32>,
      %c0_26 = arith.constant 0 : index
      %c0_27 = arith.constant 0 : index
      %42 = vector.load %arg3[%c0_26, %c0_27] : memref<8x128xf32, #tpu.memory_space<vmem>>, vector<8x128xf32>
      %c0_28 = arith.constant 0 : index
      %c0_29 = arith.constant 0 : index
      %43 = vector.load %arg10[%c0_28, %c0_29] : memref<8x128xf32, #tpu.memory_space<vmem>>, vector<8x128xf32>
      tpu.vector_store %arg10[%c0_28, %c0_29], %42 {strides = array<i32>} : memref<8x128xf32, #tpu.memory_space<vmem>>, vector<8x128xf32>,
    } else {
    }
    %c0 = arith.constant 0 : index
    %c0_1 = arith.constant 0 : index
    %3 = vector.load %arg5[%c0, %c0_1] : memref<1x512xf32, #tpu.memory_space<vmem>>, vector<1x512xf32>
    %4 = vector.shape_cast %3 : vector<1x512xf32> to vector<1x512xf32>
    %5 = vector.broadcast %4 : vector<1x512xf32> to vector<8x512xf32>
    %c0_i32_2 = arith.constant 0 : i32
    %c0_3 = arith.constant 0 : index
    %c0_4 = arith.constant 0 : index
    %6 = vector.load %arg9[%c0_3, %c0_4] : memref<8x128xf32, #tpu.memory_space<vmem>>, vector<8x128xf32>
    %c0_5 = arith.constant 0 : index
    %c0_6 = arith.constant 0 : index
    %7 = vector.load %arg10[%c0_5, %c0_6] : memref<8x128xf32, #tpu.memory_space<vmem>>, vector<8x128xf32>
    %c0_7 = arith.constant 0 : index
    %c0_8 = arith.constant 0 : index
    %8 = vector.load %arg4[%c0_7, %c0_8] : memref<128x512xf32, #tpu.memory_space<vmem>>, vector<128x512xf32>
    %cst = arith.constant dense<0.000000e+00> : vector<8x512xf32>
    %9 = tpu.matmul %6, %8, %cst {dimension_numbers = #tpu.dot_dimension_numbers<[1], [0], [0], [1], [0, 0, 1, 1], [], []>} : vector<8x128xf32>, vector<128x512xf32>, vector<8x512xf32> -> vector<8x512xf32>
    %10 = arith.index_cast %c0_i32_2 : i32 to index
    %c0_9 = arith.constant 0 : index
    %c0_10 = arith.constant 0 : index
    %11 = vector.load %arg1[%10, %c0_9, %c0_10] : memref<1x8x512xf32, #tpu.memory_space<vmem>>, vector<1x8x512xf32>
    %12 = vector.shape_cast %11 : vector<1x8x512xf32> to vector<8x512xf32>
    %13 = arith.addf %12, %9 : vector<8x512xf32>
    %14 = arith.addf %13, %5 : vector<8x512xf32>
    %cst_11 = arith.constant 5.000000e-01 : f32
    %15 = vector.broadcast %cst_11 : f32 to vector<8x512xf32>
    %16 = arith.mulf %15, %14 : vector<8x512xf32>
    %17 = math.tanh %16 : vector<8x512xf32>
    %cst_12 = arith.constant 1.000000e+00 : f32
    %18 = vector.broadcast %cst_12 : f32 to vector<8x512xf32>
    %19 = arith.addf %17, %18 : vector<8x512xf32>
    %cst_13 = arith.constant 5.000000e-01 : f32
    %20 = vector.broadcast %cst_13 : f32 to vector<8x512xf32>
    %21 = arith.mulf %20, %19 : vector<8x512xf32>
    %22 = vector.extract_strided_slice %21 {offsets = [0, 0], sizes = [8, 128], strides = [1, 1]} : vector<8x512xf32> to vector<8x128xf32>
    %23 = vector.extract_strided_slice %21 {offsets = [0, 128], sizes = [8, 128], strides = [1, 1]} : vector<8x512xf32> to vector<8x128xf32>
    %24 = vector.extract_strided_slice %21 {offsets = [0, 256], sizes = [8, 128], strides = [1, 1]} : vector<8x512xf32> to vector<8x128xf32>
    %25 = vector.extract_strided_slice %21 {offsets = [0, 384], sizes = [8, 128], strides = [1, 1]} : vector<8x512xf32> to vector<8x128xf32>
    %26 = arith.mulf %23, %7 : vector<8x128xf32>
    %27 = arith.subf %24, %22 : vector<8x128xf32>
    %28 = arith.addf %26, %27 : vector<8x128xf32>
    %29 = math.tanh %28 : vector<8x128xf32>
    %30 = arith.subf %29, %25 : vector<8x128xf32>
    %c0_14 = arith.constant 0 : index
    %c0_15 = arith.constant 0 : index
    %31 = vector.load %arg9[%c0_14, %c0_15] : memref<8x128xf32, #tpu.memory_space<vmem>>, vector<8x128xf32>
    tpu.vector_store %arg9[%c0_14, %c0_15], %30 {strides = array<i32>} : memref<8x128xf32, #tpu.memory_space<vmem>>, vector<8x128xf32>,
    %c0_16 = arith.constant 0 : index
    %c0_17 = arith.constant 0 : index
    %32 = vector.load %arg10[%c0_16, %c0_17] : memref<8x128xf32, #tpu.memory_space<vmem>>, vector<8x128xf32>
    tpu.vector_store %arg10[%c0_16, %c0_17], %28 {strides = array<i32>} : memref<8x128xf32, #tpu.memory_space<vmem>>, vector<8x128xf32>,
    %33 = arith.index_cast %c0_i32_2 : i32 to index
    %c0_18 = arith.constant 0 : index
    %c0_19 = arith.constant 0 : index
    %34 = vector.load %arg6[%33, %c0_18, %c0_19] : memref<1x8x128xf32, #tpu.memory_space<vmem>>, vector<1x8x128xf32>
    %35 = vector.shape_cast %34 : vector<1x8x128xf32> to vector<8x128xf32>
    %36 = vector.shape_cast %30 : vector<8x128xf32> to vector<1x8x128xf32>
    tpu.vector_store %arg6[%33, %c0_18, %c0_19], %36 {strides = array<i32>} : memref<1x8x128xf32, #tpu.memory_space<vmem>>, vector<1x8x128xf32>,
    %c1_i32 = arith.constant 1 : i32
    %c0_i32_20 = arith.constant 0 : i32
    %37 = arith.cmpi eq, %arg0, %c0_i32_20 : i32
    %38 = arith.extui %37 : i1 to i32
    %c0_i32_21 = arith.constant 0 : i32
    %39 = arith.cmpi ne, %38, %c0_i32_21 : i32
    scf.if %39 {
      %c0_22 = arith.constant 0 : index
      %c0_23 = arith.constant 0 : index
      %40 = vector.load %arg9[%c0_22, %c0_23] : memref<8x128xf32, #tpu.memory_space<vmem>>, vector<8x128xf32>
      %c0_24 = arith.constant 0 : index
      %c0_25 = arith.constant 0 : index
      %41 = vector.load %arg7[%c0_24, %c0_25] : memref<8x128xf32, #tpu.memory_space<vmem>>, vector<8x128xf32>
      tpu.vector_store %arg7[%c0_24, %c0_25], %40 {strides = array<i32>} : memref<8x128xf32, #tpu.memory_space<vmem>>, vector<8x128xf32>,
      %c0_26 = arith.constant 0 : index
      %c0_27 = arith.constant 0 : index
      %42 = vector.load %arg10[%c0_26, %c0_27] : memref<8x128xf32, #tpu.memory_space<vmem>>, vector<8x128xf32>
      %c0_28 = arith.constant 0 : index
      %c0_29 = arith.constant 0 : index
      %43 = vector.load %arg8[%c0_28, %c0_29] : memref<8x128xf32, #tpu.memory_space<vmem>>, vector<8x128xf32>
      tpu.vector_store %arg8[%c0_28, %c0_29], %42 {strides = array<i32>} : memref<8x128xf32, #tpu.memory_space<vmem>>, vector<8x128xf32>,
    } else {
    }
    return
  }
  func.func @transform_0(%arg0: i32) -> (i32, i32, i32) {
    %c0_i32 = arith.constant 0 : i32
    %c0_i32_0 = arith.constant 0 : i32
    %c0_i32_1 = arith.constant 0 : i32
    return %arg0, %c0_i32, %c0_i32_0 : i32, i32, i32
  }
  func.func @transform_1(%arg0: i32) -> (i32, i32) {
    %c0_i32 = arith.constant 0 : i32
    %c0_i32_0 = arith.constant 0 : i32
    %c0_i32_1 = arith.constant 0 : i32
    return %c0_i32, %c0_i32_0 : i32, i32
  }
  func.func @transform_2(%arg0: i32) -> (i32, i32) {
    %c0_i32 = arith.constant 0 : i32
    %c0_i32_0 = arith.constant 0 : i32
    %c0_i32_1 = arith.constant 0 : i32
    return %c0_i32, %c0_i32_0 : i32, i32
  }
  func.func @transform_3(%arg0: i32) -> (i32, i32) {
    %c0_i32 = arith.constant 0 : i32
    %c0_i32_0 = arith.constant 0 : i32
    %c0_i32_1 = arith.constant 0 : i32
    return %c0_i32, %c0_i32_0 : i32, i32
  }
  func.func @transform_4(%arg0: i32) -> (i32, i32) {
    %c0_i32 = arith.constant 0 : i32
    %c0_i32_0 = arith.constant 0 : i32
    %c0_i32_1 = arith.constant 0 : i32
    return %c0_i32, %c0_i32_0 : i32, i32
  }
  func.func @transform_5(%arg0: i32) -> (i32, i32, i32) {
    %c0_i32 = arith.constant 0 : i32
    %c0_i32_0 = arith.constant 0 : i32
    %c0_i32_1 = arith.constant 0 : i32
    return %arg0, %c0_i32, %c0_i32_0 : i32, i32, i32
  }
  func.func @transform_6(%arg0: i32) -> (i32, i32) {
    %c0_i32 = arith.constant 0 : i32
    %c0_i32_0 = arith.constant 0 : i32
    %c0_i32_1 = arith.constant 0 : i32
    return %c0_i32, %c0_i32_0 : i32, i32
  }
  func.func @transform_7(%arg0: i32) -> (i32, i32) {
    %c0_i32 = arith.constant 0 : i32
    %c0_i32_0 = arith.constant 0 : i32
    %c0_i32_1 = arith.constant 0 : i32
    return %c0_i32, %c0_i32_0 : i32, i32
  }
}

</mosaic_0001>

<bundles_post_ra>
// kernel: premul_sublstm_cell.1
= control target key start
LH: loop header
LB: loop body
LE: loop exit
PB: predicated region body
PF: predicated region fallthrough
CT: control target
= control target key end

     0   :  { %13 = vsyncpa [#allocation5], 0  ;;  %s613_s0 = inlined_call_operand.vmem [shape: f32[1,8,512], index: 0, kind: input, shape index: {}]   ;;  %s614_s1 = inlined_call_operand.vmem [shape: f32[8,128], index: 1, kind: input, shape index: {}, may-alias: {1,6}]   ;;  %s615_s2 = inlined_call_operand.vmem [shape: f32[8,128], index: 2, kind: input, shape index: {}, may-alias: {2,7}]   ;;  %s616_s3 = inlined_call_operand.hbm [shape: f32[128,512], index: 3, kind: input, shape index: {}]   ;;  %s617_s4 = inlined_call_operand.hbm [shape: f32[1,512], index: 4, kind: input, shape index: {}]   ;;  %s618_s5 = inlined_call_operand.hbm [shape: f32[1,8,128], index: 5, kind: output, shape index: {0}]   ;;  %s619_s6 = inlined_call_operand.vmem [shape: f32[8,128], index: 6, kind: output, shape index: {1}, may-alias: {1,6}]   ;;  %s620_s7 = inlined_call_operand.vmem [shape: f32[8,128], index: 7, kind: output, shape index: {2}, may-alias: {2,7}]  }
   0x1   :  { %14 = vsyncpa [#allocation8], 0 }
   0x2   :  { %15 = vsyncpa [#allocation6], 0  ;;  %s507_s24 = smov [#allocation4]   ;;  %s435_s28 = scalar_lea.hbm %s616_s3, 8192 }
   0x3   :  { %s27_s25 = sshll.u32 %s507_s24, 4  ;;  %p436_p0 = scmp.ne.s32.totalorder %s616_s3, %s435_s28  ;;  %s28_s25 = int_to_ptr.vmem [resolvable:$true] %s27_s25 }
   0x4   :  { %p439_p1 = scmp.lt.u32.totalorder %s435_s28, %s616_s3 }
   0x6   :  { %p441_p2 = pnand %p439_p1, %p436_p0 }
   0x8   :  { %444 = shalt.err (!%p441_p2)
}
   0x9   :  { %s445_s10 = scalar_lea.vmem %s28_s25, 8192  ;;  %p450_p4 = scmp.lt.s32.totalorder %s28_s25, %s28_s25 }
   0xa   :  { %p446_p3 = scmp.ne.s32.totalorder %s28_s25, %s445_s10  ;;  %p451_p5 = scmp.lt.s32.totalorder %s445_s10, %s445_s10 }
   0xc   :  { %p452_p6 = por %p451_p5, %p450_p4 }
   0xe   :  { %p453_p7 = pnand %p452_p6, %p446_p3 }
  0x10   :  { %456 = shalt.err (!%p453_p7)
}
  0x11   :  { %s508_s11 = smov 512   ;;  %s509_s12 = smov 32  }
  0x12   :  { %33 = dma.hbm_to_vmem [thread:$0]  %s616_s3, 8192, %s28_s25, [#allocation5], %s508_s11, %s508_s11, %s509_s12  }
  0x13   :  { %s510_s15 = smov [#allocation7]   ;;  %s457_s19 = scalar_lea.hbm %s617_s4, 64 }
  0x14   :  { %s40_s16 = sshll.u32 %s510_s15, 4  ;;  %p458_p8 = scmp.ne.s32.totalorder %s617_s4, %s457_s19  ;;  %s41_s16 = int_to_ptr.vmem [resolvable:$true] %s40_s16 }
  0x15   :  { %p461_p9 = scmp.lt.u32.totalorder %s457_s19, %s617_s4 }
  0x17   :  { %p463_p10 = pnand %p461_p9, %p458_p8 }
  0x19   :  { %466 = shalt.err (!%p463_p10)
}
  0x1a   :  { %s467_s24 = scalar_lea.vmem %s41_s16, 64  ;;  %p472_p12 = scmp.lt.s32.totalorder %s41_s16, %s41_s16 }
  0x1b   :  { %p468_p11 = scmp.ne.s32.totalorder %s41_s16, %s467_s24  ;;  %p473_p13 = scmp.lt.s32.totalorder %s467_s24, %s467_s24 }
  0x1d   :  { %p474_p0 = por %p473_p13, %p472_p12 }
  0x1f   :  { %p475_p1 = pnand %p474_p0, %p468_p11 }
  0x21   :  { %478 = shalt.err (!%p475_p1)
}
  0x22   :  { %43 = dma.hbm_to_vmem [thread:$0]  %s617_s4, 64, %s41_s16, [#allocation8]  }
  0x23   :  { %501 = dma.done.wait [#allocation5], 8192  }
  0x24   :  { %502 = vsyncadd [#allocation5], 4294959104 }
  0x25   :  { %503 = dma.done.wait [#allocation8], 64  }
  0x26   :  { %504 = vsyncadd [#allocation8], 4294967232  ;;  %v511_v0 = vmov 0.0   ;;  %v83_v1 = vld [vmem:[#allocation4 + $0x8] sm:$0xff]  ;;  %v85_v3 = vld [vmem:[#allocation4 + $0x18] sm:$0xff]  ;;  %s512_s14 = smov [#allocation9]  }
  0x27   :  { %210 = vmatprep.mubr.f32.mxu0 %v511_v0  ;;  %281 = vmatprep.mubr.f32.mxu1 %v511_v0  ;;  %v87_v2 = vld [vmem:[#allocation4 + $0x28] sm:$0xff]  ;;  %v89_v5 = vld [vmem:[#allocation4 + $0x38] sm:$0xff]  ;;  %v82_v6 = vld [vmem:[#allocation4] sm:$0xff]  ;;  %s337_s15 = sshll.u32 %s512_s14, 4  ;;  %s338_s15 = int_to_ptr.vmem [resolvable:$true] %s337_s15 }
  0x28   :  { %v355_v4 = vpack.c.bf16 %v87_v2, %v83_v1  ;;  %v86_v7 = vld [vmem:[#allocation4 + $0x20] sm:$0xff]  ;;  %v387_v8 = vpack.c.bf16 %v89_v5, %v85_v3  ;;  %v84_v10 = vld [vmem:[#allocation4 + $0x10] sm:$0xff]  ;;  %v91_v12 = vld [vmem:[#allocation4 + $0x48] sm:$0xff]  ;;  %s479_s17 = scalar_lea.vmem %s338_s15, 128  ;;  %p484_p3 = scmp.lt.s32.totalorder %s338_s15, %s338_s15 }
  0x29   :  { %v357_v9 = vpack.c.bf16 %v86_v7, %v82_v6  ;;  %v88_v11 = vld [vmem:[#allocation4 + $0x30] sm:$0xff]  ;;  %v95_v14 = vld [vmem:[#allocation4 + $0x68] sm:$0xff]  ;;  %v93_v15 = vld [vmem:[#allocation4 + $0x58] sm:$0xff]  ;;  %p480_p2 = scmp.ne.s32.totalorder %s338_s15, %s479_s17  ;;  %p485_p4 = scmp.lt.s32.totalorder %s479_s17, %s479_s17 }
  0x2a   :  { %356 = vmatprep.subr.bf16.mxu0 %v355_v4  ;;  %v389_v13 = vpack.c.bf16 %v88_v11, %v84_v10  ;;  %v97_v16 = vld [vmem:[#allocation4 + $0x78] sm:$0xff]  ;;  %388 = vmatprep.subr.bf16.mxu1 %v387_v8  ;;  %v359_v17 = vpack.c.bf16 %v95_v14, %v91_v12  ;;  %v90_v19 = vld [vmem:[#allocation4 + $0x40] sm:$0xff]  ;;  %v92_v21 = vld [vmem:[#allocation4 + $0x50] sm:$0xff] }
  0x2b   :  { %358 = vmatpush1.bf16.msra.mxu0 %v357_v9  ;;  %v391_v18 = vpack.c.bf16 %v97_v16, %v93_v15  ;;  %v94_v20 = vld [vmem:[#allocation4 + $0x60] sm:$0xff]  ;;  %v96_v23 = vld [vmem:[#allocation4 + $0x70] sm:$0xff]  ;;  %v99_v24 = vld [vmem:[#allocation4 + $0x88] sm:$0xff]  ;;  %p486_p5 = por %p485_p4, %p484_p3 }
  0x2c   :  { %390 = vmatpush1.bf16.msra.mxu1 %v389_v13  ;;  %v361_v22 = vpack.c.bf16 %v94_v20, %v90_v19  ;;  %v103_v25 = vld [vmem:[#allocation4 + $0xa8] sm:$0xff]  ;;  %360 = vmatprep.subr.bf16.mxu0 %v359_v17  ;;  %v393_v26 = vpack.c.bf16 %v96_v23, %v92_v21  ;;  %v101_v28 = vld [vmem:[#allocation4 + $0x98] sm:$0xff]  ;;  %v98_v30 = vld [vmem:[#allocation4 + $0x80] sm:$0xff] }
  0x2d   :  { %392 = vmatprep.subr.bf16.mxu1 %v391_v18  ;;  %v363_v27 = vpack.c.bf16 %v103_v25, %v99_v24  ;;  %v105_v29 = vld [vmem:[#allocation4 + $0xb8] sm:$0xff]  ;;  %v102_v32 = vld [vmem:[#allocation4 + $0xa0] sm:$0xff]  ;;  %v100_v33 = vld [vmem:[#allocation4 + $0x90] sm:$0xff]  ;;  %p487_p6 = pnand %p486_p5, %p480_p2 }
  0x2e   :  { %v395_v31 = vpack.c.bf16 %v105_v29, %v101_v28  ;;  %v104_v34 = vld [vmem:[#allocation4 + $0xb0] sm:$0xff]  ;;  %v365_v35 = vpack.c.bf16 %v102_v32, %v98_v30  ;;  %v107_v36 = vld [vmem:[#allocation4 + $0xc8] sm:$0xff]  ;;  %v109_v38 = vld [vmem:[#allocation4 + $0xd8] sm:$0xff] }
  0x2f   :  { %362 = vmatpush1.bf16.msra.mxu0 %v361_v22  ;;  %v111_v37 = vld [vmem:[#allocation4 + $0xe8] sm:$0xff]  ;;  %v397_v39 = vpack.c.bf16 %v104_v34, %v100_v33  ;;  %v113_v41 = vld [vmem:[#allocation4 + $0xf8] sm:$0xff]  ;;  %v106_v42 = vld [vmem:[#allocation4 + $0xc0] sm:$0xff]  ;;  %v60_v34 = vlaneseq }
  0x30   :  { %394 = vmatpush1.bf16.msra.mxu1 %v393_v26  ;;  %364 = vmatprep.subr.bf16.mxu0 %v363_v27  ;;  %v367_v40 = vpack.c.bf16 %v111_v37, %v107_v36  ;;  %v110_v43 = vld [vmem:[#allocation4 + $0xe0] sm:$0xff]  ;;  %v399_v44 = vpack.c.bf16 %v113_v41, %v109_v38  ;;  %v108_v45 = vld [vmem:[#allocation4 + $0xd0] sm:$0xff]  ;;  %v115_v47 = vld [vmem:[#allocation4 + $0x108] sm:$0xff] }
  0x31   :  { %396 = vmatprep.subr.bf16.mxu1 %v395_v31  ;;  %v112_v46 = vld [vmem:[#allocation4 + $0xf0] sm:$0xff]  ;;  %v119_v48 = vld [vmem:[#allocation4 + $0x128] sm:$0xff]  ;;  %v117_v49 = vld [vmem:[#allocation4 + $0x118] sm:$0xff]  ;;  %v369_v51 = vpack.c.bf16 %v110_v43, %v106_v42 }
  0x32   :  { %v121_v50 = vld [vmem:[#allocation4 + $0x138] sm:$0xff]  ;;  %v401_v52 = vpack.c.bf16 %v112_v46, %v108_v45  ;;  %v371_v53 = vpack.c.bf16 %v119_v48, %v115_v47  ;;  %v114_v54 = vld [vmem:[#allocation4 + $0x100] sm:$0xff]  ;;  %v116_v56 = vld [vmem:[#allocation4 + $0x110] sm:$0xff] }
  0x33   :  { %366 = vmatpush1.bf16.msra.mxu0 %v365_v35  ;;  %v118_v55 = vld [vmem:[#allocation4 + $0x120] sm:$0xff]  ;;  %v403_v57 = vpack.c.bf16 %v121_v50, %v117_v49  ;;  %v120_v58 = vld [vmem:[#allocation4 + $0x130] sm:$0xff]  ;;  %v123_v59 = vld [vmem:[#allocation4 + $0x148] sm:$0xff]  ;;  %v61_v35 = vshrl.u32 %v60_v34, 7 }
  0x34   :  { %398 = vmatpush1.bf16.msra.mxu1 %v397_v39  ;;  %368 = vmatprep.subr.bf16.mxu0 %v367_v40  ;;  %v127_v60 = vld [vmem:[#allocation4 + $0x168] sm:$0xff]  ;;  %v125_v61 = vld [vmem:[#allocation4 + $0x158] sm:$0xff]  ;;  %v373_v63 = vpack.c.bf16 %v118_v55, %v114_v54  ;;  %v405_v0 = vpack.c.bf16 %v120_v58, %v116_v56  ;;  %v122_v2 = vld [vmem:[#allocation4 + $0x140] sm:$0xff] }
  0x35   :  { %400 = vmatprep.subr.bf16.mxu1 %v399_v44  ;;  %v129_v62 = vld [vmem:[#allocation4 + $0x178] sm:$0xff]  ;;  %v375_v1 = vpack.c.bf16 %v127_v60, %v123_v59  ;;  %v126_v3 = vld [vmem:[#allocation4 + $0x160] sm:$0xff]  ;;  %v124_v4 = vld [vmem:[#allocation4 + $0x150] sm:$0xff]  ;;  %v62_v36 = vsub.s32 0, %v61_v35  ;;  %v70_v38 = vsub.s32 2, %v61_v35  ;;  %v66_v39 = vsub.s32 1, %v61_v35 }
  0x36   :  { %v407_v5 = vpack.c.bf16 %v129_v62, %v125_v61  ;;  %v128_v6 = vld [vmem:[#allocation4 + $0x170] sm:$0xff]  ;;  %v131_v7 = vld [vmem:[#allocation4 + $0x188] sm:$0xff]  ;;  %v133_v9 = vld [vmem:[#allocation4 + $0x198] sm:$0xff]  ;;  %v377_v11 = vpack.c.bf16 %v126_v3, %v122_v2  ;;  %v74_v56 = vsub.s32 3, %v61_v35 }
  0x37   :  { %370 = vmatpush1.bf16.msra.mxu0 %v369_v51  ;;  %v135_v8 = vld [vmem:[#allocation4 + $0x1a8] sm:$0xff]  ;;  %v137_v10 = vld [vmem:[#allocation4 + $0x1b8] sm:$0xff]  ;;  %v409_v12 = vpack.c.bf16 %v128_v6, %v124_v4  ;;  %v130_v14 = vld [vmem:[#allocation4 + $0x180] sm:$0xff] }
  0x38   :  { %402 = vmatpush1.bf16.msra.mxu1 %v401_v52  ;;  %372 = vmatprep.subr.bf16.mxu0 %v371_v53  ;;  %v379_v13 = vpack.c.bf16 %v135_v8, %v131_v7  ;;  %v134_v15 = vld [vmem:[#allocation4 + $0x1a0] sm:$0xff]  ;;  %v132_v16 = vld [vmem:[#allocation4 + $0x190] sm:$0xff]  ;;  %v411_v17 = vpack.c.bf16 %v137_v10, %v133_v9  ;;  %v139_v19 = vld [vmem:[#allocation4 + $0x1c8] sm:$0xff] }
  0x39   :  { %404 = vmatprep.subr.bf16.mxu1 %v403_v57  ;;  %v136_v18 = vld [vmem:[#allocation4 + $0x1b0] sm:$0xff]  ;;  %v143_v20 = vld [vmem:[#allocation4 + $0x1e8] sm:$0xff]  ;;  %v141_v21 = vld [vmem:[#allocation4 + $0x1d8] sm:$0xff]  ;;  %v381_v23 = vpack.c.bf16 %v134_v15, %v130_v14 }
  0x3a   :  { %v145_v22 = vld [vmem:[#allocation4 + $0x1f8] sm:$0xff]  ;;  %v413_v24 = vpack.c.bf16 %v136_v18, %v132_v16  ;;  %v383_v25 = vpack.c.bf16 %v143_v20, %v139_v19  ;;  %v138_v26 = vld [vmem:[#allocation4 + $0x1c0] sm:$0xff]  ;;  %v140_v29 = vld [vmem:[#allocation4 + $0x1d0] sm:$0xff] }
  0x3b   :  { %374 = vmatpush1.bf16.msra.mxu0 %v373_v63  ;;  %v142_v27 = vld [vmem:[#allocation4 + $0x1e0] sm:$0xff]  ;;  %v415_v28 = vpack.c.bf16 %v145_v22, %v141_v21  ;;  %v144_v30 = vld [vmem:[#allocation4 + $0x1f0] sm:$0xff]  ;;  %v289_v43 = vld [vmem:[%s613_s0 + $0x8] sm:$0xff] }
  0x3c   :  { %406 = vmatpush1.bf16.msra.mxu1 %v405_v0  ;;  %376 = vmatprep.subr.bf16.mxu0 %v375_v1  ;;  %v385_v31 = vpack.c.bf16 %v142_v27, %v138_v26  ;;  %v417_v32 = vpack.c.bf16 %v144_v30, %v140_v29  ;;  %v54_v33 = vld [vmem:[%s614_s1] sm:$0xff]  ;;  %v290_v42 = vld [vmem:[%s613_s0 + $0x10] sm:$0xff]  ;;  %v291_v58 = vld [vmem:[%s613_s0 + $0x18] sm:$0xff] }
  0x3d   :  { %408 = vmatprep.subr.bf16.mxu1 %v407_v5  ;;  %v58_v37 = vld [vmem:[#allocation7] sm:$0xf] }
  0x3e   :  { %v288_v40 = vld [vmem:[%s613_s0] sm:$0xff]  ;;  %v63_v41 = vrot.slane %v58_v37, %v62_v36  ;;  %v71_v45 = vrot.slane %v58_v37, %v70_v38  ;;  %v67_v46 = vrot.slane %v58_v37, %v66_v39  ;;  %v75_v61 = vrot.slane %v58_v37, %v74_v56 }
  0x3f   :  { %378 = vmatpush1.bf16.msra.mxu0 %v377_v11  ;;  %v56_v9 = vld [vmem:[%s615_s2] sm:$0xff] }
  0x40   :  { %410 = vmatpush1.bf16.msra.mxu1 %v409_v12  ;;  %380 = vmatprep.subr.bf16.mxu0 %v379_v13 }
  0x41   :  { %412 = vmatprep.subr.bf16.mxu1 %v411_v17 }
  0x43   :  { %382 = vmatpush1.bf16.msra.mxu0 %v381_v23 }
  0x44   :  { %414 = vmatpush1.bf16.msra.mxu1 %v413_v24  ;;  %384 = vmatprep.subr.bf16.mxu0 %v383_v25 }
  0x45   :  { %416 = vmatprep.subr.bf16.mxu1 %v415_v28 }
  0x47   :  { %386 = vmatpush1.bf16.msra.mxu0 %v385_v31 }
  0x48   :  { %418 = vmatpush1.bf16.msra.mxu1 %v417_v32 }
  0x4a   :  { %211 = vmatmul.mubr.f32.vlgmr.msra.gmra.mrb[0].mxu0 %v54_v33 }
  0x4b   :  { %282 = vmatmul.mubr.f32.vlgmr.msra.gmra.mrb[0].mxu1 %v54_v33 }
 0x11d   :  { %v212_v44 = vpop.f32.mrb[0].mxu0 }
 0x11e   :  { %v292_v47 = vadd.f32 %v288_v40, %v212_v44  ;;  %v283_v48 = vpop.f32.mrb[0].mxu1  ;;  %v214_v49 = vpop.f32.mrb[1].mxu0 }
 0x11f   :  { %v294_v50 = vadd.f32 %v290_v42, %v283_v48  ;;  %v293_v51 = vadd.f32 %v289_v43, %v214_v49  ;;  %v285_v52 = vpop.f32.mrb[1].mxu1 }
 0x120   :  { %v296_v53 = vadd.f32 %v292_v47, %v63_v41  ;;  %v295_v62 = vadd.f32 %v291_v58, %v285_v52 }
 0x121   :  { %v298_v54 = vadd.f32 %v294_v50, %v71_v45  ;;  %v297_v55 = vadd.f32 %v293_v51, %v67_v46 }
 0x122   :  { %v300_v57 = vmul.f32 0.5, %v296_v53  ;;  %v299_v63 = vadd.f32 %v295_v62, %v75_v61 }
 0x123   :  { %v302_v59 = vmul.f32 0.5, %v298_v54  ;;  %v301_v60 = vmul.f32 0.5, %v297_v55 }
 0x124   :  { %425 = vtanh.f32 %v300_v57  ;;  %v303_v0 = vmul.f32 0.5, %v299_v63 }
 0x125   :  { %427 = vtanh.f32 %v302_v59 }
 0x126   :  { %429 = vtanh.f32 %v301_v60 }
 0x127   :  { %431 = vtanh.f32 %v303_v0 }
 0x12e   :  { %v426_v1 = vpop.eup %425 }
 0x12f   :  { %v428_v2 = vpop.eup %427  ;;  %v308_v3 = vadd.f32 1.0, %v426_v1 }
 0x130   :  { %v430_v4 = vpop.eup %429  ;;  %v310_v5 = vadd.f32 1.0, %v428_v2 }
 0x131   :  { %v312_v6 = vmul.f32 0.5, %v308_v3  ;;  %v309_v7 = vadd.f32 1.0, %v430_v4  ;;  %v432_v14 = vpop.eup %431 }
 0x132   :  { %v314_v8 = vmul.f32 0.5, %v310_v5  ;;  %v311_v15 = vadd.f32 1.0, %v432_v14 }
 0x133   :  { %v313_v10 = vmul.f32 0.5, %v309_v7 }
 0x134   :  { %v317_v11 = vsub.f32 %v314_v8, %v312_v6  ;;  %v315_v16 = vmul.f32 0.5, %v311_v15 }
 0x135   :  { %v316_v12 = vmul.f32 %v313_v10, %v56_v9 }
 0x137   :  { %v318_v13 = vadd.f32 %v317_v11, %v316_v12 }
 0x139   :  { %433 = vtanh.f32 %v318_v13  ;;  %330 = vst [vmem:[%s620_s7] sm:$0xff] %v318_v13 }
 0x143   :  { %v434_v17 = vpop.eup %433 }
 0x144   :  { %v320_v18 = vsub.f32 %v434_v17, %v315_v16 }
 0x146   :  { %323 = vst [vmem:[#allocation9] sm:$0xff] %v320_v18  ;;  %328 = vst [vmem:[%s619_s6] sm:$0xff] %v320_v18 }
 0x147   :  { %490 = shalt.err (!%p487_p6)
}
 0x148   :  { %s491_s19 = scalar_lea.hbm %s618_s5, 128 }
 0x149   :  { %p492_p7 = scmp.ne.s32.totalorder %s618_s5, %s491_s19  ;;  %p495_p8 = scmp.lt.u32.totalorder %s491_s19, %s618_s5 }
 0x14b   :  { %p497_p9 = pnand %p495_p8, %p492_p7 }
 0x14d   :  { %500 = shalt.err (!%p497_p9)
}
 0x14e   :  { %340 = dma.vmem_to_hbm [thread:$0]  %s338_s15, 128, %s618_s5, [#allocation6]  }
 0x14f   :  { %505 = dma.done.wait [#allocation6], 128  }
 0x150   :  { %506 = vsyncadd [#allocation6], 4294967168 }
 0x151   :  { %352 = vsyncpa [#allocation5], 1 }
 0x152   :  { %353 = vsyncpa [#allocation8], 1 }
 0x153   :  { %354 = vsyncpa [#allocation6], 1 }

</bundles_post_ra>
